<compile_context>
chip_gen: v5e
topology: v5e:2x2
jax: 0.10.0
libtpu: 0.0.40
codegen_flags: <defaults>
</compile_context>

<pallas_src>
import math

import jax
import jax.numpy as jnp
import numpy as np
from jax.experimental import pallas as pl
from jax.experimental.pallas import tpu as pltpu

# ---- config (small, consistent with the module) ----
B = 2          # batch
T = 8          # sequence length (== block_size)
C = 32         # n_embd
N_HEAD = 4
HEAD_DIM = C // N_HEAD
BT = B * T     # folded rows
LN_EPS = 1e-5
GELU_K = math.sqrt(2.0 / math.pi)

# Block-diagonal causal bias over the folded (B*T) rows, computed once at trace time:
# row attends to col iff same batch element AND col <= row.
_IDX = np.arange(BT)
_ALLOWED = (_IDX[:, None] >= _IDX[None, :]) & (_IDX[:, None] // T == _IDX[None, :] // T)
_MASK_BIAS_NP = np.where(_ALLOWED, 0.0, -1e30).astype(np.float32)


def block_kernel(x_ref, mask_ref,
                 ln1g_ref, ln1b_ref,
                 wqkv_ref, bqkv_ref,
                 wproj_ref, bproj_ref,
                 ln2g_ref, ln2b_ref,
                 wfc_ref, bfc_ref,
                 wfp_ref, bfp_ref,
                 o_ref):
    x = x_ref[...]                                    # (B*T, C)

    # ---------------- LayerNorm 1 ----------------
    mu = jnp.mean(x, axis=-1, keepdims=True)
    var = jnp.mean((x - mu) ** 2, axis=-1, keepdims=True)
    h = (x - mu) * jax.lax.rsqrt(var + LN_EPS)
    h = h * ln1g_ref[...] + ln1b_ref[...]             # (BT, C)

    # ---------------- fused QKV projection ----------------
    qkv = jnp.dot(h, wqkv_ref[...],
                  preferred_element_type=jnp.float32) + bqkv_ref[...]   # (BT, 3C)

    # Head-major views (N_HEAD, B*T, HEAD_DIM) built from static lane slices.
    D = HEAD_DIM
    q = jnp.stack([qkv[:, hd * D:(hd + 1) * D] for hd in range(N_HEAD)], axis=0)
    k = jnp.stack([qkv[:, C + hd * D:C + (hd + 1) * D] for hd in range(N_HEAD)], axis=0)
    v = jnp.stack([qkv[:, 2 * C + hd * D:2 * C + (hd + 1) * D] for hd in range(N_HEAD)], axis=0)

    # ---------------- causal self-attention (all heads, one batched matmul pair) ----------------
    scale = 1.0 / math.sqrt(D)
    att = jnp.einsum('hqd,hkd->hqk', q, k,
                     preferred_element_type=jnp.float32) * scale        # (H, BT, BT)
    att = att + mask_ref[...][None, :, :]             # additive block-diagonal causal bias
    att = att - jnp.max(att, axis=-1, keepdims=True)
    p = jnp.exp(att)
    p = p * pl.reciprocal(jnp.sum(p, axis=-1, keepdims=True), approx=True)
    yh = jnp.einsum('hqk,hkd->hqd', p, v,
                    preferred_element_type=jnp.float32)                 # (H, BT, D)
    y = jnp.concatenate([yh[hd] for hd in range(N_HEAD)], axis=-1)      # (BT, C)

    attn_out = jnp.dot(y, wproj_ref[...],
                       preferred_element_type=jnp.float32) + bproj_ref[...]
    x1 = x + attn_out                                                   # residual 1

    # ---------------- LayerNorm 2 ----------------
    mu2 = jnp.mean(x1, axis=-1, keepdims=True)
    var2 = jnp.mean((x1 - mu2) ** 2, axis=-1, keepdims=True)
    h2 = (x1 - mu2) * jax.lax.rsqrt(var2 + LN_EPS)
    h2 = h2 * ln2g_ref[...] + ln2b_ref[...]

    # ---------------- MLP with NewGELU ----------------
    fc = jnp.dot(h2, wfc_ref[...],
                 preferred_element_type=jnp.float32) + bfc_ref[...]     # (BT, 4C)
    fc3 = fc * fc * fc
    act = 0.5 * fc * (1.0 + jnp.tanh(GELU_K * (fc + 0.044715 * fc3)))
    mlp_out = jnp.dot(act, wfp_ref[...],
                      preferred_element_type=jnp.float32) + bfp_ref[...]

    o_ref[...] = x1 + mlp_out                                           # residual 2


def transformer_block(x, params):
    x2d = x.reshape(BT, C)
    mask_bias = jnp.asarray(_MASK_BIAS_NP)

    def full_spec(a):
        return pl.BlockSpec(a.shape, lambda i: (0,) * a.ndim)

    in_specs = ([pl.BlockSpec((BT, C), lambda i: (0, 0)),
                 pl.BlockSpec((BT, BT), lambda i: (0, 0))] +
                [full_spec(p) for p in params])

    out2d = pl.pallas_call(
        block_kernel,
        out_shape=jax.ShapeDtypeStruct((BT, C), jnp.float32),
        grid_spec=pltpu.PrefetchScalarGridSpec(
            num_scalar_prefetch=0,
            grid=(1,),                     # single step: batch is folded into the rows
            in_specs=in_specs,
            out_specs=pl.BlockSpec((BT, C), lambda i: (0, 0)),
        ),
        compiler_params=pltpu.CompilerParams(
            dimension_semantics=("arbitrary",)),
    )(x2d, mask_bias, *params)
    return out2d.reshape(B, T, C)


# ---------------- pure-JAX reference (mirrors the PyTorch forward) ----------------
def reference_block(x, params):
    (ln1g, ln1b, wqkv, bqkv, wproj, bproj,
     ln2g, ln2b, wfc, bfc, wfp, bfp) = params

    def ln(z, g, b):
        mu = jnp.mean(z, axis=-1, keepdims=True)
        var = jnp.mean((z - mu) ** 2, axis=-1, keepdims=True)
        return (z - mu) * jax.lax.rsqrt(var + LN_EPS) * g + b

    h = ln(x, ln1g[0], ln1b[0])
    qkv = h @ wqkv + bqkv[0]
    q, k, v = jnp.split(qkv, 3, axis=-1)

    def to_heads(z):  # (B,T,C) -> (B,H,T,D)
        return z.reshape(B, T, N_HEAD, HEAD_DIM).transpose(0, 2, 1, 3)

    q, k, v = to_heads(q), to_heads(k), to_heads(v)
    att = jnp.einsum('bhtd,bhsd->bhts', q, k) / math.sqrt(HEAD_DIM)
    mask = jnp.tril(jnp.ones((T, T), dtype=bool))
    att = jnp.where(mask, att, -jnp.inf)
    att = jax.nn.softmax(att, axis=-1)
    y = jnp.einsum('bhts,bhsd->bhtd', att, v)
    y = y.transpose(0, 2, 1, 3).reshape(B, T, C)
    x1 = x + (y @ wproj + bproj[0])

    h2 = ln(x1, ln2g[0], ln2b[0])
    fc = h2 @ wfc + bfc[0]
    act = 0.5 * fc * (1.0 + jnp.tanh(GELU_K * (fc + 0.044715 * fc ** 3)))
    return x1 + (act @ wfp + bfp[0])


if __name__ == "__main__":
    key = jax.random.PRNGKey(0)
    keys = jax.random.split(key, 8)

    x = jax.random.normal(keys[0], (B, T, C), dtype=jnp.float32)

    # Parameters (Linear weights stored pre-transposed: (in, out) so kernel does h @ W)
    ln1g = jnp.ones((1, C), jnp.float32)
    ln1b = jnp.zeros((1, C), jnp.float32)
    wqkv = 0.02 * jax.random.normal(keys[1], (C, 3 * C), jnp.float32)
    bqkv = jnp.zeros((1, 3 * C), jnp.float32)
    wproj = 0.02 * jax.random.normal(keys[2], (C, C), jnp.float32)
    bproj = jnp.zeros((1, C), jnp.float32)
    ln2g = jnp.ones((1, C), jnp.float32)
    ln2b = jnp.zeros((1, C), jnp.float32)
    wfc = 0.02 * jax.random.normal(keys[3], (C, 4 * C), jnp.float32)
    bfc = jnp.zeros((1, 4 * C), jnp.float32)
    wfp = 0.02 * jax.random.normal(keys[4], (4 * C, C), jnp.float32)
    bfp = jnp.zeros((1, C), jnp.float32)

    params = (ln1g, ln1b, wqkv, bqkv, wproj, bproj,
              ln2g, ln2b, wfc, bfc, wfp, bfp)

    out = transformer_block(x, params)
    out = jax.block_until_ready(out)

    ref = reference_block(x, params)
    # tolerance relaxed slightly (1e-3) for the approximate EUP reciprocal in softmax
    np.testing.assert_allclose(np.asarray(out), np.asarray(ref),
                               rtol=1e-3, atol=1e-3)
    print("KERNEL_OK")
</pallas_src>

<mosaic_0001>
module attributes {stable_mosaic.version = 11 : i64} {
  func.func @block_kernel(%arg0: i32, %arg1: memref<16x32xf32, #tpu.memory_space<vmem>>, %arg2: memref<16x16xf32, #tpu.memory_space<vmem>>, %arg3: memref<1x32xf32, #tpu.memory_space<vmem>>, %arg4: memref<1x32xf32, #tpu.memory_space<vmem>>, %arg5: memref<32x96xf32, #tpu.memory_space<vmem>>, %arg6: memref<1x96xf32, #tpu.memory_space<vmem>>, %arg7: memref<32x32xf32, #tpu.memory_space<vmem>>, %arg8: memref<1x32xf32, #tpu.memory_space<vmem>>, %arg9: memref<1x32xf32, #tpu.memory_space<vmem>>, %arg10: memref<1x32xf32, #tpu.memory_space<vmem>>, %arg11: memref<32x128xf32, #tpu.memory_space<vmem>>, %arg12: memref<1x128xf32, #tpu.memory_space<vmem>>, %arg13: memref<128x32xf32, #tpu.memory_space<vmem>>, %arg14: memref<1x32xf32, #tpu.memory_space<vmem>>, %arg15: memref<16x32xf32, #tpu.memory_space<vmem>>) attributes {dimension_semantics = [#tpu.dimension_semantics<arbitrary>], iteration_bounds = array<i64: 1>, scalar_prefetch = 0 : i64, scratch_operands = 0 : i64, tpu.core_type = #tpu.core_type<tc>, window_params = [{pipeline_mode = #tpu.pipeline_mode<synchronous>, transform_indices = @transform_0, window_bounds = array<i64: 16, 32>}, {pipeline_mode = #tpu.pipeline_mode<synchronous>, transform_indices = @transform_1, window_bounds = array<i64: 16, 16>}, {pipeline_mode = #tpu.pipeline_mode<synchronous>, transform_indices = @transform_2, window_bounds = array<i64: 1, 32>}, {pipeline_mode = #tpu.pipeline_mode<synchronous>, transform_indices = @transform_3, window_bounds = array<i64: 1, 32>}, {pipeline_mode = #tpu.pipeline_mode<synchronous>, transform_indices = @transform_4, window_bounds = array<i64: 32, 96>}, {pipeline_mode = #tpu.pipeline_mode<synchronous>, transform_indices = @transform_5, window_bounds = array<i64: 1, 96>}, {pipeline_mode = #tpu.pipeline_mode<synchronous>, transform_indices = @transform_6, window_bounds = array<i64: 32, 32>}, {pipeline_mode = #tpu.pipeline_mode<synchronous>, transform_indices = @transform_7, window_bounds = array<i64: 1, 32>}, {pipeline_mode = #tpu.pipeline_mode<synchronous>, transform_indices = @transform_8, window_bounds = array<i64: 1, 32>}, {pipeline_mode = #tpu.pipeline_mode<synchronous>, transform_indices = @transform_9, window_bounds = array<i64: 1, 32>}, {pipeline_mode = #tpu.pipeline_mode<synchronous>, transform_indices = @transform_10, window_bounds = array<i64: 32, 128>}, {pipeline_mode = #tpu.pipeline_mode<synchronous>, transform_indices = @transform_11, window_bounds = array<i64: 1, 128>}, {pipeline_mode = #tpu.pipeline_mode<synchronous>, transform_indices = @transform_12, window_bounds = array<i64: 128, 32>}, {pipeline_mode = #tpu.pipeline_mode<synchronous>, transform_indices = @transform_13, window_bounds = array<i64: 1, 32>}, {pipeline_mode = #tpu.pipeline_mode<synchronous>, transform_indices = @transform_14, window_bounds = array<i64: 16, 32>}]} {
    %c0 = arith.constant 0 : index
    %c0_0 = arith.constant 0 : index
    %0 = vector.load %arg1[%c0, %c0_0] : memref<16x32xf32, #tpu.memory_space<vmem>>, vector<16x32xf32>
    %cst = arith.constant dense<0.000000e+00> : vector<16xf32>
    %1 = vector.multi_reduction <add>, %0, %cst [1] : vector<16x32xf32> to vector<16xf32>
    %2 = vector.shape_cast %1 : vector<16xf32> to vector<16x1xf32>
    %cst_1 = arith.constant 3.200000e+01 : f32
    %3 = vector.broadcast %cst_1 : f32 to vector<16x1xf32>
    %4 = arith.divf %2, %3 : vector<16x1xf32>
    %5 = vector.broadcast %4 : vector<16x1xf32> to vector<16x32xf32>
    %6 = arith.subf %0, %5 : vector<16x32xf32>
    %7 = arith.mulf %6, %6 : vector<16x32xf32>
    %cst_2 = arith.constant dense<0.000000e+00> : vector<16xf32>
    %8 = vector.multi_reduction <add>, %7, %cst_2 [1] : vector<16x32xf32> to vector<16xf32>
    %9 = vector.shape_cast %8 : vector<16xf32> to vector<16x1xf32>
    %cst_3 = arith.constant 3.200000e+01 : f32
    %10 = vector.broadcast %cst_3 : f32 to vector<16x1xf32>
    %11 = arith.divf %9, %10 : vector<16x1xf32>
    %12 = vector.broadcast %4 : vector<16x1xf32> to vector<16x32xf32>
    %13 = arith.subf %0, %12 : vector<16x32xf32>
    %cst_4 = arith.constant 9.99999974E-6 : f32
    %14 = vector.broadcast %cst_4 : f32 to vector<16x1xf32>
    %15 = arith.addf %11, %14 : vector<16x1xf32>
    %16 = math.rsqrt %15 : vector<16x1xf32>
    %17 = vector.broadcast %16 : vector<16x1xf32> to vector<16x32xf32>
    %18 = arith.mulf %13, %17 : vector<16x32xf32>
    %c0_5 = arith.constant 0 : index
    %c0_6 = arith.constant 0 : index
    %19 = vector.load %arg3[%c0_5, %c0_6] : memref<1x32xf32, #tpu.memory_space<vmem>>, vector<1x32xf32>
    %20 = vector.broadcast %19 : vector<1x32xf32> to vector<16x32xf32>
    %21 = arith.mulf %18, %20 : vector<16x32xf32>
    %c0_7 = arith.constant 0 : index
    %c0_8 = arith.constant 0 : index
    %22 = vector.load %arg4[%c0_7, %c0_8] : memref<1x32xf32, #tpu.memory_space<vmem>>, vector<1x32xf32>
    %23 = vector.broadcast %22 : vector<1x32xf32> to vector<16x32xf32>
    %24 = arith.addf %21, %23 : vector<16x32xf32>
    %c0_9 = arith.constant 0 : index
    %c0_10 = arith.constant 0 : index
    %25 = vector.load %arg5[%c0_9, %c0_10] : memref<32x96xf32, #tpu.memory_space<vmem>>, vector<32x96xf32>
    %cst_11 = arith.constant dense<0.000000e+00> : vector<16x96xf32>
    %26 = tpu.matmul %24, %25, %cst_11 {dimension_numbers = #tpu.dot_dimension_numbers<[1], [0], [0], [1], [0, 0, 1, 1], [], []>} : vector<16x32xf32>, vector<32x96xf32>, vector<16x96xf32> -> vector<16x96xf32>
    %c0_12 = arith.constant 0 : index
    %c0_13 = arith.constant 0 : index
    %27 = vector.load %arg6[%c0_12, %c0_13] : memref<1x96xf32, #tpu.memory_space<vmem>>, vector<1x96xf32>
    %28 = vector.broadcast %27 : vector<1x96xf32> to vector<16x96xf32>
    %29 = arith.addf %26, %28 : vector<16x96xf32>
    %30 = vector.extract_strided_slice %29 {offsets = [0, 0], sizes = [16, 8], strides = [1, 1]} : vector<16x96xf32> to vector<16x8xf32>
    %31 = vector.extract_strided_slice %29 {offsets = [0, 8], sizes = [16, 8], strides = [1, 1]} : vector<16x96xf32> to vector<16x8xf32>
    %32 = vector.extract_strided_slice %29 {offsets = [0, 16], sizes = [16, 8], strides = [1, 1]} : vector<16x96xf32> to vector<16x8xf32>
    %33 = vector.extract_strided_slice %29 {offsets = [0, 24], sizes = [16, 8], strides = [1, 1]} : vector<16x96xf32> to vector<16x8xf32>
    %34 = vector.shape_cast %30 : vector<16x8xf32> to vector<1x16x8xf32>
    %35 = vector.shape_cast %31 : vector<16x8xf32> to vector<1x16x8xf32>
    %36 = vector.shape_cast %32 : vector<16x8xf32> to vector<1x16x8xf32>
    %37 = vector.shape_cast %33 : vector<16x8xf32> to vector<1x16x8xf32>
    %38 = tpu.concatenate %34, %35, %36, %37 in 0 : vector<1x16x8xf32>, vector<1x16x8xf32>, vector<1x16x8xf32>, vector<1x16x8xf32> -> vector<4x16x8xf32>
    %39 = vector.extract_strided_slice %29 {offsets = [0, 32], sizes = [16, 8], strides = [1, 1]} : vector<16x96xf32> to vector<16x8xf32>
    %40 = vector.extract_strided_slice %29 {offsets = [0, 40], sizes = [16, 8], strides = [1, 1]} : vector<16x96xf32> to vector<16x8xf32>
    %41 = vector.extract_strided_slice %29 {offsets = [0, 48], sizes = [16, 8], strides = [1, 1]} : vector<16x96xf32> to vector<16x8xf32>
    %42 = vector.extract_strided_slice %29 {offsets = [0, 56], sizes = [16, 8], strides = [1, 1]} : vector<16x96xf32> to vector<16x8xf32>
    %43 = vector.shape_cast %39 : vector<16x8xf32> to vector<1x16x8xf32>
    %44 = vector.shape_cast %40 : vector<16x8xf32> to vector<1x16x8xf32>
    %45 = vector.shape_cast %41 : vector<16x8xf32> to vector<1x16x8xf32>
    %46 = vector.shape_cast %42 : vector<16x8xf32> to vector<1x16x8xf32>
    %47 = tpu.concatenate %43, %44, %45, %46 in 0 : vector<1x16x8xf32>, vector<1x16x8xf32>, vector<1x16x8xf32>, vector<1x16x8xf32> -> vector<4x16x8xf32>
    %48 = vector.extract_strided_slice %29 {offsets = [0, 64], sizes = [16, 8], strides = [1, 1]} : vector<16x96xf32> to vector<16x8xf32>
    %49 = vector.extract_strided_slice %29 {offsets = [0, 72], sizes = [16, 8], strides = [1, 1]} : vector<16x96xf32> to vector<16x8xf32>
    %50 = vector.extract_strided_slice %29 {offsets = [0, 80], sizes = [16, 8], strides = [1, 1]} : vector<16x96xf32> to vector<16x8xf32>
    %51 = vector.extract_strided_slice %29 {offsets = [0, 88], sizes = [16, 8], strides = [1, 1]} : vector<16x96xf32> to vector<16x8xf32>
    %52 = vector.shape_cast %48 : vector<16x8xf32> to vector<1x16x8xf32>
    %53 = vector.shape_cast %49 : vector<16x8xf32> to vector<1x16x8xf32>
    %54 = vector.shape_cast %50 : vector<16x8xf32> to vector<1x16x8xf32>
    %55 = vector.shape_cast %51 : vector<16x8xf32> to vector<1x16x8xf32>
    %56 = tpu.concatenate %52, %53, %54, %55 in 0 : vector<1x16x8xf32>, vector<1x16x8xf32>, vector<1x16x8xf32>, vector<1x16x8xf32> -> vector<4x16x8xf32>
    "tpu.trace_start"() <{level = 10 : i32, message = "hqd,hkd->hqk"}> : () -> ()
    %cst_14 = arith.constant dense<0.000000e+00> : vector<4x16x16xf32>
    %57 = tpu.matmul %38, %47, %cst_14 {dimension_numbers = #tpu.dot_dimension_numbers<[2], [2], [1], [1], [0, 0, 0, 1, 1, 1], [0], [0]>} : vector<4x16x8xf32>, vector<4x16x8xf32>, vector<4x16x16xf32> -> vector<4x16x16xf32>
    "tpu.trace_stop"() : () -> ()
    %cst_15 = arith.constant 0.353553385 : f32
    %58 = vector.broadcast %cst_15 : f32 to vector<4x16x16xf32>
    %59 = arith.mulf %57, %58 : vector<4x16x16xf32>
    %c0_16 = arith.constant 0 : index
    %c0_17 = arith.constant 0 : index
    %60 = vector.load %arg2[%c0_16, %c0_17] : memref<16x16xf32, #tpu.memory_space<vmem>>, vector<16x16xf32>
    %61 = vector.shape_cast %60 : vector<16x16xf32> to vector<1x16x16xf32>
    %62 = vector.broadcast %61 : vector<1x16x16xf32> to vector<4x16x16xf32>
    %63 = arith.addf %59, %62 : vector<4x16x16xf32>
    %cst_18 = arith.constant dense<0xFF800000> : vector<4x16xf32>
    %64 = vector.multi_reduction <maximumf>, %63, %cst_18 [2] : vector<4x16x16xf32> to vector<4x16xf32>
    %65 = vector.shape_cast %64 : vector<4x16xf32> to vector<4x16x1xf32>
    %66 = vector.broadcast %65 : vector<4x16x1xf32> to vector<4x16x16xf32>
    %67 = arith.subf %63, %66 : vector<4x16x16xf32>
    %68 = math.exp %67 : vector<4x16x16xf32>
    %cst_19 = arith.constant dense<0.000000e+00> : vector<4x16xf32>
    %69 = vector.multi_reduction <add>, %68, %cst_19 [2] : vector<4x16x16xf32> to vector<4x16xf32>
    %70 = vector.shape_cast %69 : vector<4x16xf32> to vector<4x16x1xf32>
    %71 = tpu.reciprocal %70 {approx = true} : vector<4x16x1xf32> -> vector<4x16x1xf32>
    %72 = vector.broadcast %71 : vector<4x16x1xf32> to vector<4x16x16xf32>
    %73 = arith.mulf %68, %72 : vector<4x16x16xf32>
    "tpu.trace_start"() <{level = 10 : i32, message = "hqk,hkd->hqd"}> : () -> ()
    %cst_20 = arith.constant dense<0.000000e+00> : vector<4x16x8xf32>
    %74 = tpu.matmul %73, %56, %cst_20 {dimension_numbers = #tpu.dot_dimension_numbers<[2], [1], [1], [2], [0, 0, 0, 1, 1, 2], [0], [0]>} : vector<4x16x16xf32>, vector<4x16x8xf32>, vector<4x16x8xf32> -> vector<4x16x8xf32>
    "tpu.trace_stop"() : () -> ()
    %75 = vector.extract_strided_slice %74 {offsets = [0, 0, 0], sizes = [1, 16, 8], strides = [1, 1, 1]} : vector<4x16x8xf32> to vector<1x16x8xf32>
    %76 = vector.shape_cast %75 : vector<1x16x8xf32> to vector<16x8xf32>
    %77 = vector.extract_strided_slice %74 {offsets = [1, 0, 0], sizes = [1, 16, 8], strides = [1, 1, 1]} : vector<4x16x8xf32> to vector<1x16x8xf32>
    %78 = vector.shape_cast %77 : vector<1x16x8xf32> to vector<16x8xf32>
    %79 = vector.extract_strided_slice %74 {offsets = [2, 0, 0], sizes = [1, 16, 8], strides = [1, 1, 1]} : vector<4x16x8xf32> to vector<1x16x8xf32>
    %80 = vector.shape_cast %79 : vector<1x16x8xf32> to vector<16x8xf32>
    %81 = vector.extract_strided_slice %74 {offsets = [3, 0, 0], sizes = [1, 16, 8], strides = [1, 1, 1]} : vector<4x16x8xf32> to vector<1x16x8xf32>
    %82 = vector.shape_cast %81 : vector<1x16x8xf32> to vector<16x8xf32>
    %83 = tpu.concatenate %76, %78, %80, %82 in 1 : vector<16x8xf32>, vector<16x8xf32>, vector<16x8xf32>, vector<16x8xf32> -> vector<16x32xf32>
    %c0_21 = arith.constant 0 : index
    %c0_22 = arith.constant 0 : index
    %84 = vector.load %arg7[%c0_21, %c0_22] : memref<32x32xf32, #tpu.memory_space<vmem>>, vector<32x32xf32>
    %cst_23 = arith.constant dense<0.000000e+00> : vector<16x32xf32>
    %85 = tpu.matmul %83, %84, %cst_23 {dimension_numbers = #tpu.dot_dimension_numbers<[1], [0], [0], [1], [0, 0, 1, 1], [], []>} : vector<16x32xf32>, vector<32x32xf32>, vector<16x32xf32> -> vector<16x32xf32>
    %c0_24 = arith.constant 0 : index
    %c0_25 = arith.constant 0 : index
    %86 = vector.load %arg8[%c0_24, %c0_25] : memref<1x32xf32, #tpu.memory_space<vmem>>, vector<1x32xf32>
    %87 = vector.broadcast %86 : vector<1x32xf32> to vector<16x32xf32>
    %88 = arith.addf %85, %87 : vector<16x32xf32>
    %89 = arith.addf %0, %88 : vector<16x32xf32>
    %cst_26 = arith.constant dense<0.000000e+00> : vector<16xf32>
    %90 = vector.multi_reduction <add>, %89, %cst_26 [1] : vector<16x32xf32> to vector<16xf32>
    %91 = vector.shape_cast %90 : vector<16xf32> to vector<16x1xf32>
    %cst_27 = arith.constant 3.200000e+01 : f32
    %92 = vector.broadcast %cst_27 : f32 to vector<16x1xf32>
    %93 = arith.divf %91, %92 : vector<16x1xf32>
    %94 = vector.broadcast %93 : vector<16x1xf32> to vector<16x32xf32>
    %95 = arith.subf %89, %94 : vector<16x32xf32>
    %96 = arith.mulf %95, %95 : vector<16x32xf32>
    %cst_28 = arith.constant dense<0.000000e+00> : vector<16xf32>
    %97 = vector.multi_reduction <add>, %96, %cst_28 [1] : vector<16x32xf32> to vector<16xf32>
    %98 = vector.shape_cast %97 : vector<16xf32> to vector<16x1xf32>
    %cst_29 = arith.constant 3.200000e+01 : f32
    %99 = vector.broadcast %cst_29 : f32 to vector<16x1xf32>
    %100 = arith.divf %98, %99 : vector<16x1xf32>
    %101 = vector.broadcast %93 : vector<16x1xf32> to vector<16x32xf32>
    %102 = arith.subf %89, %101 : vector<16x32xf32>
    %cst_30 = arith.constant 9.99999974E-6 : f32
    %103 = vector.broadcast %cst_30 : f32 to vector<16x1xf32>
    %104 = arith.addf %100, %103 : vector<16x1xf32>
    %105 = math.rsqrt %104 : vector<16x1xf32>
    %106 = vector.broadcast %105 : vector<16x1xf32> to vector<16x32xf32>
    %107 = arith.mulf %102, %106 : vector<16x32xf32>
    %c0_31 = arith.constant 0 : index
    %c0_32 = arith.constant 0 : index
    %108 = vector.load %arg9[%c0_31, %c0_32] : memref<1x32xf32, #tpu.memory_space<vmem>>, vector<1x32xf32>
    %109 = vector.broadcast %108 : vector<1x32xf32> to vector<16x32xf32>
    %110 = arith.mulf %107, %109 : vector<16x32xf32>
    %c0_33 = arith.constant 0 : index
    %c0_34 = arith.constant 0 : index
    %111 = vector.load %arg10[%c0_33, %c0_34] : memref<1x32xf32, #tpu.memory_space<vmem>>, vector<1x32xf32>
    %112 = vector.broadcast %111 : vector<1x32xf32> to vector<16x32xf32>
    %113 = arith.addf %110, %112 : vector<16x32xf32>
    %c0_35 = arith.constant 0 : index
    %c0_36 = arith.constant 0 : index
    %114 = vector.load %arg11[%c0_35, %c0_36] : memref<32x128xf32, #tpu.memory_space<vmem>>, vector<32x128xf32>
    %cst_37 = arith.constant dense<0.000000e+00> : vector<16x128xf32>
    %115 = tpu.matmul %113, %114, %cst_37 {dimension_numbers = #tpu.dot_dimension_numbers<[1], [0], [0], [1], [0, 0, 1, 1], [], []>} : vector<16x32xf32>, vector<32x128xf32>, vector<16x128xf32> -> vector<16x128xf32>
    %c0_38 = arith.constant 0 : index
    %c0_39 = arith.constant 0 : index
    %116 = vector.load %arg12[%c0_38, %c0_39] : memref<1x128xf32, #tpu.memory_space<vmem>>, vector<1x128xf32>
    %117 = vector.broadcast %116 : vector<1x128xf32> to vector<16x128xf32>
    %118 = arith.addf %115, %117 : vector<16x128xf32>
    %119 = arith.mulf %118, %118 : vector<16x128xf32>
    %120 = arith.mulf %119, %118 : vector<16x128xf32>
    %cst_40 = arith.constant 5.000000e-01 : f32
    %121 = vector.broadcast %cst_40 : f32 to vector<16x128xf32>
    %122 = arith.mulf %121, %118 : vector<16x128xf32>
    %cst_41 = arith.constant 4.471500e-02 : f32
    %123 = vector.broadcast %cst_41 : f32 to vector<16x128xf32>
    %124 = arith.mulf %123, %120 : vector<16x128xf32>
    %125 = arith.addf %118, %124 : vector<16x128xf32>
    %cst_42 = arith.constant 0.797884583 : f32
    %126 = vector.broadcast %cst_42 : f32 to vector<16x128xf32>
    %127 = arith.mulf %126, %125 : vector<16x128xf32>
    %128 = math.tanh %127 : vector<16x128xf32>
    %cst_43 = arith.constant 1.000000e+00 : f32
    %129 = vector.broadcast %cst_43 : f32 to vector<16x128xf32>
    %130 = arith.addf %129, %128 : vector<16x128xf32>
    %131 = arith.mulf %122, %130 : vector<16x128xf32>
    %c0_44 = arith.constant 0 : index
    %c0_45 = arith.constant 0 : index
    %132 = vector.load %arg13[%c0_44, %c0_45] : memref<128x32xf32, #tpu.memory_space<vmem>>, vector<128x32xf32>
    %cst_46 = arith.constant dense<0.000000e+00> : vector<16x32xf32>
    %133 = tpu.matmul %131, %132, %cst_46 {dimension_numbers = #tpu.dot_dimension_numbers<[1], [0], [0], [1], [0, 0, 1, 1], [], []>} : vector<16x128xf32>, vector<128x32xf32>, vector<16x32xf32> -> vector<16x32xf32>
    %c0_47 = arith.constant 0 : index
    %c0_48 = arith.constant 0 : index
    %134 = vector.load %arg14[%c0_47, %c0_48] : memref<1x32xf32, #tpu.memory_space<vmem>>, vector<1x32xf32>
    %135 = vector.broadcast %134 : vector<1x32xf32> to vector<16x32xf32>
    %136 = arith.addf %133, %135 : vector<16x32xf32>
    %137 = arith.addf %89, %136 : vector<16x32xf32>
    %c0_49 = arith.constant 0 : index
    %c0_50 = arith.constant 0 : index
    %138 = vector.load %arg15[%c0_49, %c0_50] : memref<16x32xf32, #tpu.memory_space<vmem>>, vector<16x32xf32>
    tpu.vector_store %arg15[%c0_49, %c0_50], %137 {strides = array<i32>} : memref<16x32xf32, #tpu.memory_space<vmem>>, vector<16x32xf32>,
    return
  }
  func.func @transform_0(%arg0: i32) -> (i32, i32) {
    %c0_i32 = arith.constant 0 : i32
    %c0_i32_0 = arith.constant 0 : i32
    %c0_i32_1 = arith.constant 0 : i32
    return %c0_i32, %c0_i32_0 : i32, i32
  }
  func.func @transform_1(%arg0: i32) -> (i32, i32) {
    %c0_i32 = arith.constant 0 : i32
    %c0_i32_0 = arith.constant 0 : i32
    %c0_i32_1 = arith.constant 0 : i32
    return %c0_i32, %c0_i32_0 : i32, i32
  }
  func.func @transform_2(%arg0: i32) -> (i32, i32) {
    %c0_i32 = arith.constant 0 : i32
    %c0_i32_0 = arith.constant 0 : i32
    %c0_i32_1 = arith.constant 0 : i32
    return %c0_i32, %c0_i32_0 : i32, i32
  }
  func.func @transform_3(%arg0: i32) -> (i32, i32) {
    %c0_i32 = arith.constant 0 : i32
    %c0_i32_0 = arith.constant 0 : i32
    %c0_i32_1 = arith.constant 0 : i32
    return %c0_i32, %c0_i32_0 : i32, i32
  }
  func.func @transform_4(%arg0: i32) -> (i32, i32) {
    %c0_i32 = arith.constant 0 : i32
    %c0_i32_0 = arith.constant 0 : i32
    %c0_i32_1 = arith.constant 0 : i32
    return %c0_i32, %c0_i32_0 : i32, i32
  }
  func.func @transform_5(%arg0: i32) -> (i32, i32) {
    %c0_i32 = arith.constant 0 : i32
    %c0_i32_0 = arith.constant 0 : i32
    %c0_i32_1 = arith.constant 0 : i32
    return %c0_i32, %c0_i32_0 : i32, i32
  }
  func.func @transform_6(%arg0: i32) -> (i32, i32) {
    %c0_i32 = arith.constant 0 : i32
    %c0_i32_0 = arith.constant 0 : i32
    %c0_i32_1 = arith.constant 0 : i32
    return %c0_i32, %c0_i32_0 : i32, i32
  }
  func.func @transform_7(%arg0: i32) -> (i32, i32) {
    %c0_i32 = arith.constant 0 : i32
    %c0_i32_0 = arith.constant 0 : i32
    %c0_i32_1 = arith.constant 0 : i32
    return %c0_i32, %c0_i32_0 : i32, i32
  }
  func.func @transform_8(%arg0: i32) -> (i32, i32) {
    %c0_i32 = arith.constant 0 : i32
    %c0_i32_0 = arith.constant 0 : i32
    %c0_i32_1 = arith.constant 0 : i32
    return %c0_i32, %c0_i32_0 : i32, i32
  }
  func.func @transform_9(%arg0: i32) -> (i32, i32) {
    %c0_i32 = arith.constant 0 : i32
    %c0_i32_0 = arith.constant 0 : i32
    %c0_i32_1 = arith.constant 0 : i32
    return %c0_i32, %c0_i32_0 : i32, i32
  }
  func.func @transform_10(%arg0: i32) -> (i32, i32) {
    %c0_i32 = arith.constant 0 : i32
    %c0_i32_0 = arith.constant 0 : i32
    %c0_i32_1 = arith.constant 0 : i32
    return %c0_i32, %c0_i32_0 : i32, i32
  }
  func.func @transform_11(%arg0: i32) -> (i32, i32) {
    %c0_i32 = arith.constant 0 : i32
    %c0_i32_0 = arith.constant 0 : i32
    %c0_i32_1 = arith.constant 0 : i32
    return %c0_i32, %c0_i32_0 : i32, i32
  }
  func.func @transform_12(%arg0: i32) -> (i32, i32) {
    %c0_i32 = arith.constant 0 : i32
    %c0_i32_0 = arith.constant 0 : i32
    %c0_i32_1 = arith.constant 0 : i32
    return %c0_i32, %c0_i32_0 : i32, i32
  }
  func.func @transform_13(%arg0: i32) -> (i32, i32) {
    %c0_i32 = arith.constant 0 : i32
    %c0_i32_0 = arith.constant 0 : i32
    %c0_i32_1 = arith.constant 0 : i32
    return %c0_i32, %c0_i32_0 : i32, i32
  }
  func.func @transform_14(%arg0: i32) -> (i32, i32) {
    %c0_i32 = arith.constant 0 : i32
    %c0_i32_0 = arith.constant 0 : i32
    %c0_i32_1 = arith.constant 0 : i32
    return %c0_i32, %c0_i32_0 : i32, i32
  }
}

</mosaic_0001>

<bundles_post_ra>
// kernel: tpu_custom_call.1
= control target key start
LH: loop header
LB: loop body
LE: loop exit
PB: predicated region body
PF: predicated region fallthrough
CT: control target
= control target key end

     0   :  { %vm50_vm0 = vcmask 261120   ;;  %s1320_s0 = inlined_call_operand.vmem [shape: f32[16,32], index: 0, kind: input, shape index: {}]   ;;  %s1321_s1 = inlined_call_operand.vmem [shape: f32[16,16], index: 1, kind: input, shape index: {}]   ;;  %s1322_s2 = inlined_call_operand.vmem [shape: f32[1,32], index: 2, kind: input, shape index: {}]   ;;  %s1323_s3 = inlined_call_operand.vmem [shape: f32[1,32], index: 3, kind: input, shape index: {}]   ;;  %s1324_s4 = inlined_call_operand.vmem [shape: f32[32,96], index: 4, kind: input, shape index: {}]   ;;  %s1325_s5 = inlined_call_operand.vmem [shape: f32[1,96], index: 5, kind: input, shape index: {}]   ;;  %s1326_s6 = inlined_call_operand.vmem [shape: f32[32,32], index: 6, kind: input, shape index: {}]   ;;  %s1327_s7 = inlined_call_operand.vmem [shape: f32[1,32], index: 7, kind: input, shape index: {}]   ;;  %s1328_s8 = inlined_call_operand.vmem [shape: f32[1,32], index: 8, kind: input, shape index: {}]   ;;  %s1329_s9 = inlined_call_operand.vmem [shape: f32[1,32], index: 9, kind: input, shape index: {}]   ;;  %s1330_s10 = inlined_call_operand.vmem [shape: f32[32,128], index: 10, kind: input, shape index: {}]   ;;  %s1331_s11 = inlined_call_operand.vmem [shape: f32[1,128], index: 11, kind: input, shape index: {}]   ;;  %s1332_s12 = inlined_call_operand.vmem [shape: f32[128,32], index: 12, kind: input, shape index: {}]   ;;  %s1333_s13 = inlined_call_operand.vmem [shape: f32[1,32], index: 13, kind: input, shape index: {}]   ;;  %s1334_s14 = inlined_call_operand.hbm [shape: f32[16,32], index: 14, kind: output, shape index: {}]  }
   0x1   :  { %v1031_v0 = vld [vmem:[%s1320_s0] sm:$0xff] }
   0x2   :  { %v51_v1 = vsel %vm50_vm0, %v1031_v0, 0.0 }
   0x3   :  { %52 = vadd.xlane.f32.xlu0 %v51_v1 }
   0x4   :  { %19 = vsyncpa [#allocation3], 0  ;;  %v1038_v2 = vld [vmem:[%s1320_s0 + $0x8] sm:$0xff]  ;;  %v942_v4 = vmov 32.0   ;;  %v117_v21 = vld [vmem:[%s1324_s4 + $0x18] sm:$0xff]  ;;  %s944_s28 = smov 120  }
   0x5   :  { %v54_v3 = vsel %vm50_vm0, %v1038_v2, 0.0  ;;  %870 = vrcp.f32 %v942_v4  ;;  %140 = vmatpush.msra.mxu0 %v117_v21  ;;  %v116_v22 = vld [vmem:[%s1324_s4 + $0x10] sm:$0xff]  ;;  %v115_v23 = vld [vmem:[%s1324_s4 + $0x8] sm:$0xff]  ;;  %v114_v24 = vld [vmem:[%s1324_s4] sm:$0xff]  ;;  %s945_s29 = smov 104   ;;  %vm169_vm8 = vcmask 64512  }
   0x6   :  { %v862_v39 = vld [vmem:[%s1322_s2] ss:$0 sm:$0xff]  ;;  %vm324_vm9 = vcmask 130048   ;;  %s948_s17 = smov 24   ;;  %s949_s18 = smov 16   ;;  %vm581_vm10 = vcmask 195584  }
   0x7   :  { %141 = vmatpush.msra.mxu0 %v116_v22  ;;  %v863_v43 = vld [vmem:[%s1323_s3] ss:$0 sm:$0xff]  ;;  %s943_s3 = smov 112   ;;  %s950_s19 = smov 8  }
   0x8   :  { %v864_v53 = vld [vmem:[%s1325_s5] ss:$0 sm:$0xff]  ;;  %s946_s5 = smov 96   ;;  %s787_s25 = sshll.u32 %s1334_s14, 4  ;;  %s788_s25 = int_to_ptr.hbm [resolvable:$true] %s787_s25 }
   0x9   :  { %142 = vmatpush.msra.mxu0 %v115_v23  ;;  %s951_s26 = smov [#allocation2]  }
   0xb   :  { %55 = vadd.xlane.f32.xlu0 %v54_v3  ;;  %v871_v5 = vpop.eup %870  ;;  %143 = vmatpush.msra.mxu0 %v114_v24 }
   0xc   :  { %v58_v6 = vmul.f32 32.0, %v871_v5  ;;  %vm62_vm1 = vweird.f32 %v871_v5 }
   0xe   :  { %v59_v7 = vsub.f32 1.0, %v58_v6 }
  0x10   :  { %v60_v8 = vmul.f32 %v871_v5, %v59_v7 }
  0x12   :  { %v61_v9 = vadd.f32 %v871_v5, %v60_v8 }
  0x14   :  { %v1042_v10 = vsel %vm62_vm1, %v871_v5, %v61_v9 }
  0x76   :  { %v53_v11 = vpop.xlane.xlu0 %52 }
  0x77   :  { %v64_v12 = vmul.f32 %v1042_v10, %v53_v11 }
  0x79   :  { %v66_v13 = vsub.f32 %v1031_v0, %v64_v12 }
  0x7b   :  { %v68_v14 = vmul.f32 %v66_v13, %v66_v13 }
  0x7d   :  { %v70_v15 = vsel %vm50_vm0, %v68_v14, 0.0 }
  0x7e   :  { %71 = vadd.xlane.f32.xlu1 %v70_v15  ;;  %v56_v16 = vpop.xlane.xlu0 %55 }
  0x7f   :  { %v65_v17 = vmul.f32 %v1042_v10, %v56_v16 }
  0x81   :  { %v67_v18 = vsub.f32 %v1038_v2, %v65_v17  ;;  %v315_v17 = vld [vmem:[%s1321_s1 + $0x8] sm:$0xff] }
  0x83   :  { %v69_v19 = vmul.f32 %v67_v18, %v67_v18 }
  0x85   :  { %v73_v20 = vsel %vm50_vm0, %v69_v19, 0.0 }
  0x86   :  { %74 = vadd.xlane.f32.xlu1 %v73_v20 }
  0xf1   :  { %v72_v25 = vpop.xlane.xlu1 %71 }
  0xf2   :  { %v76_v26 = vmul.f32 %v72_v25, %v1042_v10 }
  0xf4   :  { %v78_v27 = vadd.f32 1e-05, %v76_v26 }
  0xf6   :  { %872 = vrsqrt.f32 %v78_v27  ;;  %vm86_vm3 = vweird.f32 %v78_v27 }
  0xf9   :  { %v75_v28 = vpop.xlane.xlu1 %74 }
  0xfa   :  { %v77_v29 = vmul.f32 %v75_v28, %v1042_v10 }
  0xfc   :  { %v873_v30 = vpop.eup %872  ;;  %v79_v31 = vadd.f32 1e-05, %v77_v29 }
  0xfd   :  { %v81_v32 = vmul.f32 %v873_v30, %v78_v27  ;;  %vm87_vm2 = vweird.f32 %v873_v30 }
  0xfe   :  { %874 = vrsqrt.f32 %v79_v31  ;;  %vm88_vm4 = vmor %vm86_vm3, %vm87_vm2  ;;  %vm96_vm5 = vweird.f32 %v79_v31 }
  0xff   :  { %v82_v33 = vmul.f32 %v873_v30, %v81_v32 }
 0x101   :  { %v83_v34 = vmul.f32 0.5, %v82_v33 }
 0x103   :  { %v84_v35 = vsub.f32 1.5, %v83_v34 }
 0x104   :  { %v875_v36 = vpop.eup %874 }
 0x105   :  { %v85_v37 = vmul.f32 %v873_v30, %v84_v35  ;;  %v91_v38 = vmul.f32 %v875_v36, %v79_v31  ;;  %vm97_vm6 = vweird.f32 %v875_v36 }
 0x106   :  { %vm98_vm7 = vmor %vm96_vm5, %vm97_vm6 }
 0x107   :  { %v89_v40 = vsel %vm88_vm4, %v873_v30, %v85_v37  ;;  %v92_v41 = vmul.f32 %v875_v36, %v91_v38 }
 0x108   :  { %v100_v42 = vmul.f32 %v89_v40, %v66_v13  ;;  %v314_v13 = vld [vmem:[%s1321_s1] sm:$0xff]  ;;  %s947_s1 = smov 64  }
 0x109   :  { %v93_v44 = vmul.f32 0.5, %v92_v41 }
 0x10a   :  { %v106_v45 = vmul.f32 %v862_v39, %v100_v42 }
 0x10b   :  { %v94_v46 = vsub.f32 1.5, %v93_v44 }
 0x10c   :  { %v112_v47 = vadd.f32 %v863_v43, %v106_v45 }
 0x10d   :  { %v95_v48 = vmul.f32 %v875_v36, %v94_v46 }
 0x10e   :  { %799 = vmatmul.msk.f32.vlgmr.msra.gmra.mxu0 %vm50_vm0, %v112_v47 }
 0x10f   :  { %v99_v49 = vsel %vm98_vm7, %v875_v36, %v95_v48 }
 0x110   :  { %v101_v50 = vmul.f32 %v99_v49, %v67_v18 }
 0x112   :  { %v107_v51 = vmul.f32 %v862_v39, %v101_v50 }
 0x114   :  { %v113_v52 = vadd.f32 %v863_v43, %v107_v51 }
 0x116   :  { %800 = vmatmul.msk.f32.gmra.mxu0 %vm50_vm0, %v113_v52 }
 0x18b   :  { %v145_v54 = vpop.f32.mrf.mxu0 }
 0x18c   :  { %v1075_v55 = vadd.f32 %v864_v53, %v145_v54 }
 0x18e   :  { %157 = vrot.lane.b32.xlu1 %v1075_v55, %s943_s3 }
 0x193   :  { %v148_v56 = vpop.f32.mrf.mxu0 }
 0x194   :  { %v1078_v57 = vadd.f32 %v864_v53, %v148_v56 }
 0x196   :  { %159 = vrot.lane.b32.xlu0 %v1078_v57, %s943_s3  ;;  %155 = vrot.lane.b32.xlu2 %v1078_v57, %s944_s28 }
 0x19e   :  { %153 = vrot.lane.b32.xlu2 %v1075_v55, %s944_s28 }
 0x1a6   :  { %163 = vrot.lane.b32.xlu2 %v1078_v57, %s945_s29 }
 0x1ae   :  { %161 = vrot.lane.b32.xlu2 %v1075_v55, %s945_s29 }
 0x1f0   :  { %v1085_v58 = vpop.permute.xlu2 %155 }
 0x1f1   :  { %203 = vrot.lane.b32.xlu2 %v1085_v58, %s946_s5 }
 0x1f8   :  { %v1088_v59 = vpop.permute.xlu2 %153 }
 0x1f9   :  { %201 = vrot.lane.b32.xlu0 %v1088_v59, %s946_s5 }
 0x200   :  { %v1091_v60 = vpop.permute.xlu2 %163  ;;  %v1093_v61 = vpop.permute.xlu1 %157 }
 0x201   :  { %273 = vrot.lane.b32.xlu0 %v1091_v60, %s946_s5  ;;  %236 = vrot.lane.b32.xlu1 %v1093_v61, %s946_s5 }
 0x208   :  { %v1097_v62 = vpop.permute.xlu0 %159  ;;  %v1102_v63 = vpop.permute.xlu2 %161 }
 0x209   :  { %238 = vrot.lane.b32.xlu2 %v1097_v62, %s946_s5  ;;  %165 = vrot.lane.b32.xlu0 %v1075_v55, %s946_s5 }
 0x20a   :  { %167 = vrot.lane.b32.xlu1 %v1078_v57, %s946_s5 }
 0x211   :  { %271 = vrot.lane.b32.xlu2 %v1102_v63, %s946_s5 }
 0x24b   :  { %v204_v1 = vpop.permute.xlu2 %203 }
 0x24c   :  { %805 = vmatpush.xpose.msk.msra.mxu2 %vm169_vm8, %v204_v1 }
 0x263   :  { %v239_v3 = vpop.permute.xlu2 %238 }
 0x264   :  { %809 = vmatpush.xpose.msk.msrb.mxu0 %vm169_vm8, %v239_v3  ;;  %829 = vmatpush.xpose.msk.msra.mxu3 %vm169_vm8, %v239_v3 }
 0x26b   :  { %v202_v4 = vpop.permute.xlu0 %201  ;;  %v272_v7 = vpop.permute.xlu2 %271 }
 0x26c   :  { %806 = vmatpush.xpose.msk.msra.mxu2 %vm169_vm8, %v202_v4 }
 0x26f   :  { %807 = vmatmul.msk.f32.vlgmr.msra.gmra.mxu2 %vm169_vm8, %v1088_v59 }
 0x273   :  { %v274_v5 = vpop.permute.xlu0 %273  ;;  %v237_v6 = vpop.permute.xlu1 %236 }
 0x274   :  { %810 = vmatpush.xpose.msk.msrb.mxu0 %vm169_vm8, %v237_v6  ;;  %830 = vmatpush.xpose.msk.msra.mxu3 %vm169_vm8, %v237_v6 }
 0x277   :  { %808 = vmatmul.msk.f32.gmra.mxu2 %vm169_vm8, %v1085_v58  ;;  %811 = vmatmul.msk.f32.vlgmr.msrb.gmra.mxu0 %vm169_vm8, %v1093_v61 }
 0x278   :  { %813 = vmatpush.xpose.msk.msra.mxu0 %vm169_vm8, %v274_v5  ;;  %812 = vmatmul.msk.f32.vlgmr.msra.gmra.mxu3 %vm169_vm8, %v1097_v62 }
 0x27b   :  { %v166_v9 = vpop.permute.xlu0 %165 }
 0x27c   :  { %814 = vmatpush.xpose.msk.msra.mxu0 %vm169_vm8, %v272_v7  ;;  %v168_v8 = vpop.permute.xlu1 %167 }
 0x27d   :  { %801 = vmatpush.xpose.msk.msra.mxu1 %vm169_vm8, %v168_v8 }
 0x27f   :  { %815 = vmatmul.msk.f32.vlgmr.msra.gmra.mxu0 %vm169_vm8, %v1102_v63 }
 0x281   :  { %802 = vmatpush.xpose.msk.msra.mxu1 %vm169_vm8, %v166_v9 }
 0x284   :  { %803 = vmatmul.msk.f32.vlgmr.msra.gmra.mxu1 %vm169_vm8, %v1075_v55 }
 0x287   :  { %816 = vmatmul.msk.f32.gmra.mxu0 %vm169_vm8, %v1091_v60 }
 0x28c   :  { %804 = vmatmul.msk.f32.gmra.mxu1 %vm169_vm8, %v1078_v57 }
 0x2f2   :  { %v230_v20 = vpop.f32.mrf.mxu2 }
 0x2f3   :  { %v308_v25 = vmul.f32 0.35355338, %v230_v20 }
 0x2f4   :  { %v265_v11 = vpop.f32.mrf.mxu0 }
 0x2f5   :  { %v310_v12 = vmul.f32 0.35355338, %v265_v11  ;;  %v318_v30 = vadd.f32 %v314_v13, %v308_v25  ;;  %v852_v11 = vpack.i.bf16 %v1102_v63, %v1091_v60 }
 0x2f7   :  { %v320_v14 = vadd.f32 %v314_v13, %v310_v12  ;;  %v331_v35 = vsel %vm324_vm9, %v318_v30, -inf }
 0x2f9   :  { %v337_v15 = vsel %vm324_vm9, %v320_v14, -inf }
 0x2fa   :  { %338 = vmax.xlane.f32.xlu1 %v337_v15  ;;  %v233_v31 = vpop.f32.mrf.mxu2  ;;  %v842_v15 = vpack.i.bf16 %v1097_v62, %v1085_v58 }
 0x2fb   :  { %v268_v16 = vpop.f32.mrf.mxu3  ;;  %v309_v33 = vmul.f32 0.35355338, %v233_v31 }
 0x2fc   :  { %v311_v18 = vmul.f32 0.35355338, %v268_v16  ;;  %v300_v27 = vpop.f32.mrf.mxu0 }
 0x2fd   :  { %v312_v34 = vmul.f32 0.35355338, %v300_v27  ;;  %v319_v38 = vadd.f32 %v315_v17, %v309_v33 }
 0x2fe   :  { %v321_v19 = vadd.f32 %v315_v17, %v311_v18 }
 0x2ff   :  { %v322_v37 = vadd.f32 %v314_v13, %v312_v34  ;;  %v334_v42 = vsel %vm324_vm9, %v319_v38, -inf }
 0x300   :  { %v340_v22 = vsel %vm324_vm9, %v321_v19, -inf }
 0x301   :  { %v195_v21 = vpop.f32.mrf.mxu1  ;;  %v343_v41 = vsel %vm324_vm9, %v322_v37, -inf }
 0x302   :  { %v306_v23 = vmul.f32 0.35355338, %v195_v21  ;;  %341 = vmax.xlane.f32.xlu1 %v340_v22 }
 0x304   :  { %v1139_v24 = vadd.f32 %v314_v13, %v306_v23  ;;  %v303_v39 = vpop.f32.mrf.mxu0 }
 0x305   :  { %v313_v40 = vmul.f32 0.35355338, %v303_v39 }
 0x306   :  { %v325_v26 = vsel %vm324_vm9, %v1139_v24, -inf }
 0x307   :  { %326 = vmax.xlane.f32.xlu2 %v325_v26  ;;  %v323_v43 = vadd.f32 %v315_v17, %v313_v40 }
 0x309   :  { %v198_v28 = vpop.f32.mrf.mxu1  ;;  %v346_v44 = vsel %vm324_vm9, %v323_v43, -inf }
 0x30a   :  { %v307_v29 = vmul.f32 0.35355338, %v198_v28 }
 0x30c   :  { %v1143_v32 = vadd.f32 %v315_v17, %v307_v29  ;;  %v847_v17 = vpack.i.bf16 %v1093_v61, %v1088_v59  ;;  %v857_v61 = vpack.i.bf16 %v1075_v55, %v1078_v57 }
 0x30e   :  { %v328_v36 = vsel %vm324_vm9, %v1143_v32, -inf }
 0x30f   :  { %332 = vmax.xlane.f32.xlu2 %v331_v35  ;;  %329 = vmax.xlane.f32.xlu0 %v328_v36 }
 0x317   :  { %344 = vmax.xlane.f32.xlu2 %v343_v41  ;;  %335 = vmax.xlane.f32.xlu0 %v334_v42 }
 0x31f   :  { %347 = vmax.xlane.f32.xlu0 %v346_v44 }
 0x36d   :  { %v339_v45 = vpop.xlane.xlu1 %338 }
 0x36e   :  { %v353_v46 = vsub.f32 %v320_v14, %v339_v45 }
 0x370   :  { %v365_v47 = vmul.f32 1.442695, %v353_v46 }
 0x372   :  { %876 = vpow2.f32 %v365_v47 }
 0x375   :  { %v342_v48 = vpop.xlane.xlu1 %341 }
 0x376   :  { %v354_v49 = vsub.f32 %v321_v19, %v342_v48 }
 0x378   :  { %v1151_v50 = vpop.eup %876  ;;  %v367_v51 = vmul.f32 1.442695, %v354_v49 }
 0x379   :  { %v385_v52 = vsel %vm324_vm9, %v1151_v50, 0.0 }
 0x37a   :  { %878 = vpow2.f32 %v367_v51  ;;  %v327_v53 = vpop.xlane.xlu2 %326  ;;  %386 = vadd.xlane.f32.xlu2 %v385_v52 }
 0x37b   :  { %v349_v23 = vsub.f32 %v1139_v24, %v327_v53 }
 0x37d   :  { %v357_v58 = vmul.f32 1.442695, %v349_v23 }
 0x380   :  { %v1155_v54 = vpop.eup %878 }
 0x381   :  { %v388_v56 = vsel %vm324_vm9, %v1155_v54, 0.0 }
 0x382   :  { %v333_v1 = vpop.xlane.xlu2 %332  ;;  %389 = vadd.xlane.f32.xlu0 %v388_v56  ;;  %v330_v14 = vpop.xlane.xlu0 %329 }
 0x383   :  { %v351_v3 = vsub.f32 %v318_v30, %v333_v1  ;;  %v350_v24 = vsub.f32 %v1143_v32, %v330_v14 }
 0x385   :  { %v361_v4 = vmul.f32 1.442695, %v351_v3  ;;  %v359_v27 = vmul.f32 1.442695, %v350_v24 }
 0x387   :  { %880 = vpow2.f32 %v361_v4 }
 0x38a   :  { %v345_v5 = vpop.xlane.xlu2 %344  ;;  %v336_v16 = vpop.xlane.xlu0 %335 }
 0x38b   :  { %v355_v6 = vsub.f32 %v322_v37, %v345_v5  ;;  %v352_v18 = vsub.f32 %v319_v38, %v336_v16 }
 0x38d   :  { %v1159_v7 = vpop.eup %880  ;;  %v369_v8 = vmul.f32 1.442695, %v355_v6  ;;  %v363_v19 = vmul.f32 1.442695, %v352_v18  ;;  %v586_v18 = vld [vmem:[%s1326_s6 + $0x10] sm:$0xff] }
 0x38e   :  { %v379_v9 = vsel %vm324_vm9, %v1159_v7, 0.0 }
 0x38f   :  { %882 = vpow2.f32 %v369_v8  ;;  %380 = vadd.xlane.f32.xlu1 %v379_v9 }
 0x390   :  { %884 = vpow2.f32 %v363_v19  ;;  %v585_v19 = vld [vmem:[%s1326_s6 + $0x8] sm:$0xff] }
 0x392   :  { %v348_v63 = vpop.xlane.xlu0 %347 }
 0x393   :  { %v356_v21 = vsub.f32 %v323_v43, %v348_v63 }
 0x395   :  { %v883_v12 = vpop.eup %882  ;;  %v371_v22 = vmul.f32 1.442695, %v356_v21 }
 0x396   :  { %v391_v13 = vsel %vm324_vm9, %v883_v12, 0.0  ;;  %853 = vrot.lane.b32.xlu0 %v852_v11, %s947_s1  ;;  %v885_v60 = vpop.eup %884 }
 0x397   :  { %392 = vadd.xlane.f32.xlu2 %v391_v13  ;;  %v382_v20 = vsel %vm324_vm9, %v885_v60, 0.0  ;;  %886 = vpow2.f32 %v371_v22 }
 0x398   :  { %888 = vpow2.f32 %v357_v58 }
 0x399   :  { %890 = vpow2.f32 %v359_v27 }
 0x39d   :  { %v1172_v62 = vpop.eup %886 }
 0x39e   :  { %v394_v59 = vsel %vm324_vm9, %v1172_v62, 0.0  ;;  %v1178_v25 = vpop.eup %888 }
 0x39f   :  { %v373_v26 = vsel %vm324_vm9, %v1178_v25, 0.0  ;;  %v891_v28 = vpop.eup %890 }
 0x3a0   :  { %v376_v29 = vsel %vm324_vm9, %v891_v28, 0.0 }
 0x3a8   :  { %843 = vrot.lane.b32.xlu1 %v842_v15, %s947_s1 }
 0x3af   :  { %848 = vrot.lane.b32.xlu2 %v847_v17, %s947_s1  ;;  %v587_v17 = vld [vmem:[%s1326_s6 + $0x18] sm:$0xff] }
 0x3c0   :  { %383 = vadd.xlane.f32.xlu0 %v382_v20 }
 0x3d2   :  { %395 = vadd.xlane.f32.xlu1 %v394_v59 }
 0x3d4   :  { %858 = vrot.lane.b32.xlu0 %v857_v61, %s947_s1 }
 0x3d8   :  { %374 = vadd.xlane.f32.xlu2 %v373_v26 }
 0x3ed   :  { %v387_v31 = vpop.xlane.xlu2 %386 }
 0x3f5   :  { %v390_v30 = vpop.xlane.xlu0 %389 }
 0x3fe   :  { %377 = vadd.xlane.f32.xlu0 %v376_v29  ;;  %v865_v29 = vld [vmem:[%s1327_s7] ss:$0 sm:$0xff] }
 0x402   :  { %v381_v36 = vpop.xlane.xlu1 %380 }
 0x408   :  { %v854_v33 = vpop.permute.xlu0 %853 }
 0x409   :  { %v855_v34 = vunpack.i.l.bf16 %v854_v33  ;;  %v856_v57 = vunpack.i.h.bf16 %v854_v33 }
 0x40a   :  { %v393_v55 = vpop.xlane.xlu2 %392 }
 0x40b   :  { %892 = vrcp.f32 %v393_v55  ;;  %544 = vmatpush.msrb.mxu0 %v855_v34 }
 0x40c   :  { %894 = vrcp.f32 %v387_v31 }
 0x40d   :  { %545 = vmatpush.msrb.mxu0 %v856_v57  ;;  %896 = vrcp.f32 %v381_v36 }
 0x40e   :  { %898 = vrcp.f32 %v390_v30 }
 0x411   :  { %v893_v35 = vpop.eup %892 }
 0x412   :  { %v411_v37 = vmul.f32 %v893_v35, %v883_v12  ;;  %v895_v32 = vpop.eup %894  ;;  %v849_v38 = vpop.permute.xlu2 %848 }
 0x413   :  { %v897_v40 = vpop.eup %896  ;;  %v850_v43 = vunpack.i.l.bf16 %v849_v38  ;;  %v851_v44 = vunpack.i.h.bf16 %v849_v38  ;;  %v409_v46 = vmul.f32 %v895_v32, %v1151_v50 }
 0x414   :  { %823 = vmatmul.msk.f32.vlgmr.msrb.gmra.mxu0 %vm324_vm9, %v411_v37  ;;  %v407_v45 = vmul.f32 %v897_v40, %v1159_v7  ;;  %v899_v47 = vpop.eup %898 }
 0x415   :  { %v410_v48 = vmul.f32 %v899_v47, %v1155_v54  ;;  %v679_v47 = vld [vmem:[%s1330_s10] sm:$0xff] }
 0x41a   :  { %v844_v39 = vpop.permute.xlu1 %843 }
 0x41b   :  { %v845_v41 = vunpack.i.l.bf16 %v844_v39  ;;  %v846_v42 = vunpack.i.h.bf16 %v844_v39 }
 0x41d   :  { %474 = vmatpush.msrb.mxu2 %v845_v41  ;;  %509 = vmatpush.msrb.mxu3 %v846_v42 }
 0x41f   :  { %475 = vmatpush.msrb.mxu2 %v850_v43  ;;  %510 = vmatpush.msrb.mxu3 %v851_v44  ;;  %v682_v44 = vld [vmem:[%s1330_s10 + $0x18] sm:$0xff] }
 0x420   :  { %819 = vmatmul.msk.f32.vlgmr.msrb.gmra.mxu2 %vm324_vm9, %v407_v45  ;;  %821 = vmatmul.msk.f32.vlgmr.msrb.gmra.mxu3 %vm324_vm9, %v409_v46  ;;  %v681_v45 = vld [vmem:[%s1330_s10 + $0x10] sm:$0xff]  ;;  %v680_v46 = vld [vmem:[%s1330_s10 + $0x8] sm:$0xff] }
 0x421   :  { %705 = vmatpush.msra.mxu2 %v682_v44 }
 0x423   :  { %706 = vmatpush.msra.mxu2 %v681_v45 }
 0x425   :  { %707 = vmatpush.msra.mxu2 %v680_v46 }
 0x427   :  { %708 = vmatpush.msra.mxu2 %v679_v47 }
 0x428   :  { %822 = vmatmul.msk.f32.gmra.mxu3 %vm324_vm9, %v410_v48 }
 0x433   :  { %v384_v49 = vpop.xlane.xlu0 %383 }
 0x434   :  { %900 = vrcp.f32 %v384_v49 }
 0x43a   :  { %v901_v51 = vpop.eup %900 }
 0x43b   :  { %v408_v52 = vmul.f32 %v901_v51, %v885_v60  ;;  %v584_v60 = vld [vmem:[%s1326_s6] sm:$0xff]  ;;  %s785_s6 = sshll.u32 %s951_s26, 4  ;;  %s786_s6 = int_to_ptr.vmem [resolvable:$true] %s785_s6 }
 0x43d   :  { %820 = vmatmul.msk.f32.gmra.mxu2 %vm324_vm9, %v408_v52 }
 0x445   :  { %v396_v53 = vpop.xlane.xlu1 %395 }
 0x446   :  { %902 = vrcp.f32 %v396_v53  ;;  %v859_v50 = vpop.permute.xlu0 %858 }
 0x447   :  { %v860_v56 = vunpack.i.l.bf16 %v859_v50  ;;  %v861_v1 = vunpack.i.h.bf16 %v859_v50 }
 0x449   :  { %439 = vmatpush.msrb.mxu1 %v860_v56 }
 0x44b   :  { %v375_v3 = vpop.xlane.xlu2 %374  ;;  %440 = vmatpush.msrb.mxu1 %v861_v1 }
 0x44c   :  { %v903_v4 = vpop.eup %902  ;;  %904 = vrcp.f32 %v375_v3 }
 0x44d   :  { %v412_v54 = vmul.f32 %v903_v4, %v1172_v62  ;;  %610 = vmatpush.msra.mxu1 %v587_v17  ;;  %v866_v4 = vld [vmem:[%s1328_s8] ss:$0 sm:$0xff] }
 0x44f   :  { %824 = vmatmul.msk.f32.gmra.mxu0 %vm324_vm9, %v412_v54  ;;  %611 = vmatpush.msra.mxu1 %v586_v18 }
 0x451   :  { %612 = vmatpush.msra.mxu1 %v585_v19 }
 0x452   :  { %v905_v5 = vpop.eup %904 }
 0x453   :  { %v405_v6 = vmul.f32 %v905_v5, %v1178_v25  ;;  %613 = vmatpush.msra.mxu1 %v584_v60 }
 0x455   :  { %817 = vmatmul.msk.f32.vlgmr.msrb.gmra.mxu1 %vm324_vm9, %v405_v6  ;;  %v867_v6 = vld [vmem:[%s1329_s9] ss:$0 sm:$0xff] }
 0x471   :  { %v378_v7 = vpop.xlane.xlu0 %377 }
 0x472   :  { %906 = vrcp.f32 %v378_v7 }
 0x478   :  { %v907_v8 = vpop.eup %906 }
 0x479   :  { %v406_v9 = vmul.f32 %v907_v8, %v891_v28 }
 0x47b   :  { %818 = vmatmul.msk.f32.gmra.mxu1 %vm324_vm9, %v406_v9  ;;  %v749_v9 = vld [vmem:[%s1332_s12 + $0x78] sm:$0xff] }
 0x47c   :  { %754 = vmatpush.msra.mxu3 %v749_v9 }
 0x491   :  { %v547_v11 = vpop.f32.mrf.mxu0 }
 0x492   :  { %571 = vrot.lane.b32.xlu0 %v547_v11, %s948_s17  ;;  %v748_v11 = vld [vmem:[%s1332_s12 + $0x70] sm:$0xff] }
 0x493   :  { %755 = vmatpush.msra.mxu3 %v748_v11 }
 0x4a3   :  { %v477_v12 = vpop.f32.mrf.mxu2  ;;  %v512_v13 = vpop.f32.mrf.mxu3 }
 0x4a4   :  { %563 = vrot.lane.b32.xlu2 %v512_v13, %s949_s18  ;;  %555 = vrot.lane.b32.xlu1 %v477_v12, %s950_s19  ;;  %v747_v12 = vld [vmem:[%s1332_s12 + $0x68] sm:$0xff] }
 0x4a5   :  { %756 = vmatpush.msra.mxu3 %v747_v12 }
 0x4ab   :  { %v515_v15 = vpop.f32.mrf.mxu3 }
 0x4c0   :  { %v480_v14 = vpop.f32.mrf.mxu2 }
 0x4c1   :  { %557 = vrot.lane.b32.xlu1 %v480_v14, %s950_s19 }
 0x4c9   :  { %565 = vrot.lane.b32.xlu1 %v515_v15, %s949_s18  ;;  %v746_v15 = vld [vmem:[%s1332_s12 + $0x60] sm:$0xff] }
 0x4ca   :  { %757 = vmatpush.msra.mxu3 %v746_v15 }
 0x4cc   :  { %v550_v16 = vpop.f32.mrf.mxu0 }
 0x4cd   :  { %573 = vrot.lane.b32.xlu2 %v550_v16, %s948_s17 }
 0x4d2   :  { %v442_v63 = vpop.f32.mrf.mxu1 }
 0x4f8   :  { %v445_v61 = vpop.f32.mrf.mxu1 }
 0x4fe   :  { %v564_v21 = vpop.permute.xlu2 %563 }
 0x504   :  { %v572_v23 = vpop.permute.xlu0 %571 }
 0x516   :  { %v556_v20 = vpop.permute.xlu1 %555 }
 0x517   :  { %v577_v22 = vsel %vm169_vm8, %v442_v63, %v556_v20 }
 0x518   :  { %v579_v58 = vsel %vm324_vm9, %v577_v22, %v564_v21 }
 0x519   :  { %v582_v62 = vsel %vm581_vm10, %v579_v58, %v572_v23  ;;  %v745_v58 = vld [vmem:[%s1332_s12 + $0x58] sm:$0xff] }
 0x51a   :  { %825 = vmatmul.msk.f32.vlgmr.msra.gmra.mxu1 %vm50_vm0, %v582_v62  ;;  %758 = vmatpush.msra.mxu3 %v745_v58  ;;  %v744_v62 = vld [vmem:[%s1332_s12 + $0x50] sm:$0xff] }
 0x51c   :  { %759 = vmatpush.msra.mxu3 %v744_v62 }
 0x527   :  { %v574_v24 = vpop.permute.xlu2 %573 }
 0x533   :  { %v558_v59 = vpop.permute.xlu1 %557 }
 0x534   :  { %v578_v25 = vsel %vm169_vm8, %v445_v61, %v558_v59  ;;  %v743_v59 = vld [vmem:[%s1332_s12 + $0x48] sm:$0xff]  ;;  %v742_v61 = vld [vmem:[%s1332_s12 + $0x40] sm:$0xff] }
 0x535   :  { %760 = vmatpush.msra.mxu3 %v743_v59 }
 0x537   :  { %761 = vmatpush.msra.mxu3 %v742_v61 }
 0x53b   :  { %v566_v26 = vpop.permute.xlu1 %565 }
 0x53c   :  { %v580_v27 = vsel %vm324_vm9, %v578_v25, %v566_v26  ;;  %v741_v25 = vld [vmem:[%s1332_s12 + $0x38] sm:$0xff]  ;;  %v740_v26 = vld [vmem:[%s1332_s12 + $0x30] sm:$0xff] }
 0x53d   :  { %v583_v28 = vsel %vm581_vm10, %v580_v27, %v574_v24  ;;  %762 = vmatpush.msra.mxu3 %v741_v25  ;;  %v739_v24 = vld [vmem:[%s1332_s12 + $0x28] sm:$0xff]  ;;  %v738_v27 = vld [vmem:[%s1332_s12 + $0x20] sm:$0xff] }
 0x53e   :  { %826 = vmatmul.msk.f32.gmra.mxu1 %vm50_vm0, %v583_v28  ;;  %v737_v28 = vld [vmem:[%s1332_s12 + $0x18] sm:$0xff] }
 0x53f   :  { %763 = vmatpush.msra.mxu3 %v740_v26 }
 0x541   :  { %764 = vmatpush.msra.mxu3 %v739_v24 }
 0x543   :  { %765 = vmatpush.msra.mxu3 %v738_v27 }
 0x545   :  { %766 = vmatpush.msra.mxu3 %v737_v28 }
 0x597   :  { %v615_v30 = vpop.f32.mrf.mxu1 }
 0x598   :  { %v616_v31 = vadd.f32 %v865_v29, %v615_v30  ;;  %v735_v30 = vld [vmem:[%s1332_s12 + $0x8] sm:$0xff] }
 0x59a   :  { %v1221_v33 = vadd.f32 %v616_v31, %v1031_v0  ;;  %v734_v31 = vld [vmem:[%s1332_s12] sm:$0xff] }
 0x59c   :  { %v623_v34 = vsel %vm50_vm0, %v1221_v33, 0.0 }
 0x59d   :  { %624 = vadd.xlane.f32.xlu1 %v623_v34  ;;  %v868_v34 = vld [vmem:[%s1331_s11] ss:$0 sm:$0xff] }
 0x5bb   :  { %v618_v55 = vpop.f32.mrf.mxu1 }
 0x5bc   :  { %v619_v57 = vadd.f32 %v865_v29, %v618_v55  ;;  %v736_v29 = vld [vmem:[%s1332_s12 + $0x10] sm:$0xff] }
 0x5bd   :  { %767 = vmatpush.msra.mxu3 %v736_v29 }
 0x5be   :  { %v1226_v35 = vadd.f32 %v619_v57, %v1038_v2 }
 0x5bf   :  { %768 = vmatpush.msra.mxu3 %v735_v30 }
 0x5c0   :  { %v626_v36 = vsel %vm50_vm0, %v1226_v35, 0.0 }
 0x5c1   :  { %627 = vadd.xlane.f32.xlu0 %v626_v36  ;;  %769 = vmatpush.msra.mxu3 %v734_v31 }
 0x610   :  { %v625_v37 = vpop.xlane.xlu1 %624 }
 0x611   :  { %v629_v32 = vmul.f32 %v625_v37, %v1042_v10 }
 0x613   :  { %v631_v38 = vsub.f32 %v1221_v33, %v629_v32 }
 0x615   :  { %v633_v0 = vmul.f32 %v631_v38, %v631_v38 }
 0x617   :  { %v635_v39 = vsel %vm50_vm0, %v633_v0, 0.0 }
 0x618   :  { %636 = vadd.xlane.f32.xlu2 %v635_v39 }
 0x634   :  { %v628_v40 = vpop.xlane.xlu0 %627 }
 0x635   :  { %v630_v41 = vmul.f32 %v628_v40, %v1042_v10 }
 0x637   :  { %v632_v42 = vsub.f32 %v1226_v35, %v630_v41 }
 0x639   :  { %v634_v2 = vmul.f32 %v632_v42, %v632_v42 }
 0x63b   :  { %v638_v43 = vsel %vm50_vm0, %v634_v2, 0.0 }
 0x63c   :  { %639 = vadd.xlane.f32.xlu1 %v638_v43 }
 0x68b   :  { %v637_v48 = vpop.xlane.xlu2 %636 }
 0x68c   :  { %v641_v49 = vmul.f32 %v637_v48, %v1042_v10 }
 0x68e   :  { %v643_v51 = vadd.f32 1e-05, %v641_v49 }
 0x690   :  { %908 = vrsqrt.f32 %v643_v51  ;;  %vm651_vm12 = vweird.f32 %v643_v51 }
 0x696   :  { %v909_v52 = vpop.eup %908 }
 0x697   :  { %v646_v53 = vmul.f32 %v909_v52, %v643_v51  ;;  %vm652_vm11 = vweird.f32 %v909_v52 }
 0x698   :  { %vm653_vm13 = vmor %vm651_vm12, %vm652_vm11 }
 0x699   :  { %v647_v50 = vmul.f32 %v909_v52, %v646_v53 }
 0x69b   :  { %v648_v56 = vmul.f32 0.5, %v647_v50  ;;  %v869_v50 = vld [vmem:[%s1333_s13] ss:$0 sm:$0xff]  ;;  %s952_s13 = smov 128  }
 0x69d   :  { %v649_v1 = vsub.f32 1.5, %v648_v56 }
 0x69f   :  { %v650_v3 = vmul.f32 %v909_v52, %v649_v1 }
 0x6a1   :  { %v654_v54 = vsel %vm653_vm13, %v909_v52, %v650_v3 }
 0x6a2   :  { %v665_v5 = vmul.f32 %v654_v54, %v631_v38 }
 0x6a4   :  { %v671_v7 = vmul.f32 %v866_v4, %v665_v5 }
 0x6a6   :  { %v677_v8 = vadd.f32 %v867_v6, %v671_v7 }
 0x6a8   :  { %827 = vmatmul.msk.f32.vlgmr.msra.gmra.mxu2 %vm50_vm0, %v677_v8 }
 0x6af   :  { %v640_v13 = vpop.xlane.xlu1 %639 }
 0x6b0   :  { %v642_v14 = vmul.f32 %v640_v13, %v1042_v10 }
 0x6b2   :  { %v644_v16 = vadd.f32 1e-05, %v642_v14 }
 0x6b4   :  { %910 = vrsqrt.f32 %v644_v16  ;;  %vm661_vm15 = vweird.f32 %v644_v16 }
 0x6ba   :  { %v911_v17 = vpop.eup %910 }
 0x6bb   :  { %v656_v18 = vmul.f32 %v911_v17, %v644_v16  ;;  %vm662_vm14 = vweird.f32 %v911_v17 }
 0x6bc   :  { %vm663_vm1 = vmor %vm661_vm15, %vm662_vm14 }
 0x6bd   :  { %v657_v19 = vmul.f32 %v911_v17, %v656_v18 }
 0x6bf   :  { %v658_v60 = vmul.f32 0.5, %v657_v19 }
 0x6c1   :  { %v659_v63 = vsub.f32 1.5, %v658_v60 }
 0x6c3   :  { %v660_v20 = vmul.f32 %v911_v17, %v659_v63 }
 0x6c5   :  { %v664_v21 = vsel %vm663_vm1, %v911_v17, %v660_v20 }
 0x6c6   :  { %v666_v22 = vmul.f32 %v664_v21, %v632_v42 }
 0x6c8   :  { %v672_v10 = vmul.f32 %v866_v4, %v666_v22 }
 0x6ca   :  { %v678_v23 = vadd.f32 %v867_v6, %v672_v10 }
 0x6cc   :  { %828 = vmatmul.msk.f32.gmra.mxu2 %vm50_vm0, %v678_v23 }
 0x72b   :  { %v710_v55 = vpop.f32.mrf.mxu2 }
 0x72c   :  { %v711_v57 = vadd.f32 %v868_v34, %v710_v55 }
 0x72e   :  { %v716_v36 = vmul.f32 %v711_v57, %v711_v57  ;;  %v720_v40 = vmul.f32 0.5, %v711_v57 }
 0x730   :  { %v718_v37 = vmul.f32 %v716_v36, %v711_v57 }
 0x732   :  { %v722_v32 = vmul.f32 0.044715, %v718_v37 }
 0x734   :  { %v724_v38 = vadd.f32 %v722_v32, %v711_v57 }
 0x736   :  { %v726_v0 = vmul.f32 0.7978846, %v724_v38 }
 0x738   :  { %912 = vtanh.f32 %v726_v0 }
 0x73e   :  { %v913_v39 = vpop.eup %912 }
 0x73f   :  { %v730_v41 = vadd.f32 1.0, %v913_v39 }
 0x741   :  { %v732_v42 = vmul.f32 %v730_v41, %v720_v40 }
 0x743   :  { %770 = vmatmul.f32.vlgmr.msra.gmra.mxu3 %v732_v42 }
 0x74f   :  { %v713_v2 = vpop.f32.mrf.mxu2 }
 0x750   :  { %v714_v43 = vadd.f32 %v868_v34, %v713_v2 }
 0x752   :  { %v717_v44 = vmul.f32 %v714_v43, %v714_v43  ;;  %v721_v51 = vmul.f32 0.5, %v714_v43 }
 0x754   :  { %v719_v45 = vmul.f32 %v717_v44, %v714_v43 }
 0x756   :  { %v723_v46 = vmul.f32 0.044715, %v719_v45 }
 0x758   :  { %v725_v47 = vadd.f32 %v723_v46, %v714_v43 }
 0x75a   :  { %v727_v48 = vmul.f32 0.7978846, %v725_v47 }
 0x75c   :  { %914 = vtanh.f32 %v727_v48 }
 0x762   :  { %v915_v49 = vpop.eup %914 }
 0x763   :  { %v731_v52 = vadd.f32 1.0, %v915_v49 }
 0x765   :  { %v733_v53 = vmul.f32 %v731_v52, %v721_v51 }
 0x767   :  { %773 = vmatmul.f32.gmra.mxu3 %v733_v53 }
 0x7c6   :  { %v771_v56 = vpop.f32.mrf.mxu3 }
 0x7c7   :  { %v772_v1 = vadd.f32 %v869_v50, %v771_v56 }
 0x7c9   :  { %v777_v3 = vadd.f32 %v772_v1, %v1221_v33 }
 0x7cb   :  { %779 = vst.msk [vmem:[#allocation2] sm:$0xff] %vm50_vm0, %v777_v3 }
 0x7ea   :  { %v774_v4 = vpop.f32.mrf.mxu3 }
 0x7eb   :  { %v775_v54 = vadd.f32 %v869_v50, %v774_v4 }
 0x7ed   :  { %v778_v5 = vadd.f32 %v775_v54, %v1226_v35 }
 0x7ef   :  { %780 = vst.msk [vmem:[#allocation2 + $0x8] sm:$0xff] %vm50_vm0, %v778_v5 }
 0x7f0   :  { %793 = dma.vmem_to_hbm [thread:$0]  %s786_s6, 256, %s788_s25, [#allocation3], %s952_s13, %s952_s13, %s950_s19  }
 0x7f1   :  { %940 = dma.done.wait [#allocation3], 256  }
 0x7f2   :  { %941 = vsyncadd [#allocation3], 4294967040 }
 0x7f3   :  { %798 = vsyncpa [#allocation3], 1 }

</bundles_post_ra>
